<compile_context>
chip_gen: v6e
topology: v6e:2x2x1
jax: 0.10.0
libtpu: 0.0.40
codegen_flags: <defaults>
</compile_context>

<pallas_src>
import jax
import jax.numpy as jnp
from jax.experimental import pallas as pl
from jax.experimental.pallas import tpu as pltpu


def _round_up(x: int, m: int) -> int:
    return (x + m - 1) // m * m


def half_bit_linear_kernel(wmax_ref, x_ref, w_ref, u_ref, b_ref, o_ref, acc_ref):
    k = pl.program_id(2)

    @pl.when(k == 0)
    def _():
        acc_ref[...] = jnp.zeros_like(acc_ref)

    w = w_ref[...]                      # (tn, tk) f32 weight tile
    u = u_ref[...]                      # (tn, tk) f32 uniforms in [0, 1)
    wmax = wmax_ref[0, 0]               # scalar: global max(|W|) (hoisted)

    # Fused quantization:  keep <=> (w > 0) and (u < |w| / max|W|)
    # written divide-free as  u * max|W| < |w|  (also safe if max|W| == 0).
    keep = jnp.logical_and(w > 0, u * wmax < jnp.abs(w))
    qw = jnp.where(keep, jnp.float32(1.0), jnp.float32(0.0)).astype(jnp.bfloat16)

    x = x_ref[...].astype(jnp.bfloat16)  # (tm, tk); bf16 MXU path, f32 accumulate

    # x @ qw.T without an explicit transpose: contract axis 1 of both operands.
    acc_ref[...] += jax.lax.dot_general(
        x, qw,
        dimension_numbers=(((1,), (1,)), ((), ())),
        preferred_element_type=jnp.float32,
    )

    @pl.when(k == pl.num_programs(2) - 1)
    def _():
        o_ref[...] = (acc_ref[...] + b_ref[...]).astype(o_ref.dtype)


def half_bit_linear(x, weight, bias, seed=0, *, tm=256, tn=256, tk=512):
    """x: (B, K) f32, weight: (N, K) f32, bias: (N,) f32 -> (B, N) f32."""
    batch, in_features = x.shape
    out_features, k2 = weight.shape
    assert k2 == in_features and bias.shape == (out_features,)

    # ---- hoisted global statistics & Bernoulli uniforms (plain JAX, one pass) ----
    w_absmax = jnp.max(jnp.abs(weight)).astype(jnp.float32).reshape(1, 1)
    u = jax.random.uniform(jax.random.PRNGKey(seed), weight.shape, dtype=jnp.float32)

    # ---- tile sizes: (8,128)-aligned, clamped to the (padded) problem size ----
    tm = min(tm, _round_up(batch, 8))          # sublane-aligned batch tile
    tn = min(tn, _round_up(out_features, 128))  # lane-dense output tile
    tk = min(tk, _round_up(in_features, 128))

    mp = _round_up(batch, tm)
    np_ = _round_up(out_features, tn)
    kp = _round_up(in_features, tk)

    # Zero-padding is semantics-preserving: padded W rows/cols quantize to 0 and
    # padded x cols are 0; padded output rows/cols are sliced off below.
    x_p = jnp.pad(x.astype(jnp.float32), ((0, mp - batch), (0, kp - in_features)))
    w_p = jnp.pad(weight.astype(jnp.float32),
                  ((0, np_ - out_features), (0, kp - in_features)))
    u_p = jnp.pad(u, ((0, np_ - out_features), (0, kp - in_features)))
    b_p = jnp.pad(bias.astype(jnp.float32), (0, np_ - out_features)).reshape(1, np_)

    grid = (mp // tm, np_ // tn, kp // tk)

    out_p = pl.pallas_call(
        half_bit_linear_kernel,
        out_shape=jax.ShapeDtypeStruct((mp, np_), jnp.float32),
        grid=grid,
        in_specs=[
            pl.BlockSpec(memory_space=pltpu.MemorySpace.SMEM),        # max|W| scalar
            pl.BlockSpec((tm, tk), lambda i, j, k: (i, k)),           # x tile
            pl.BlockSpec((tn, tk), lambda i, j, k: (j, k)),           # W tile
            pl.BlockSpec((tn, tk), lambda i, j, k: (j, k)),           # uniforms tile
            pl.BlockSpec((1, tn), lambda i, j, k: (0, j)),            # bias tile
        ],
        out_specs=pl.BlockSpec((tm, tn), lambda i, j, k: (i, j)),
        scratch_shapes=[pltpu.VMEM((tm, tn), jnp.float32)],           # f32 accumulator
        compiler_params=pltpu.CompilerParams(
            dimension_semantics=("parallel", "parallel", "arbitrary")),
    )(w_absmax, x_p, w_p, u_p, b_p)

    return out_p[:batch, :out_features]


if __name__ == "__main__":
    key = jax.random.PRNGKey(0)
    k_x, k_w, k_b = jax.random.split(key, 3)

    batch, in_features, out_features = 2, 32, 16
    seed = 0

    x = jax.random.normal(k_x, (batch, in_features), dtype=jnp.float32)
    weight = jax.random.normal(k_w, (out_features, in_features), dtype=jnp.float32)
    bias = jax.random.normal(k_b, (out_features,), dtype=jnp.float32)

    out = half_bit_linear(x, weight, bias, seed=seed)
    out = jax.block_until_ready(out)

    # Pure-JAX reference using the exact same Bernoulli uniforms (same seed).
    u = jax.random.uniform(jax.random.PRNGKey(seed), weight.shape, dtype=jnp.float32)
    norm = jnp.abs(weight) / jnp.max(jnp.abs(weight))
    qw_ref = jnp.where(weight > 0, 1.0, 0.0) * (u < norm).astype(jnp.float32)
    ref = x @ qw_ref.T + bias

    assert out.shape == (batch, out_features)
    assert out.dtype == jnp.float32
    assert bool(jnp.all(jnp.isfinite(out)))
    # bf16 activations on the MXU -> loose tolerance vs. the f32 reference.
    assert bool(jnp.allclose(out, ref, rtol=5e-2, atol=1e-1)), (out, ref)
    print("KERNEL_OK")
</pallas_src>

<mosaic_0001>
module attributes {stable_mosaic.version = 11 : i64} {
  func.func @half_bit_linear_kernel(%arg0: i32, %arg1: i32, %arg2: i32, %arg3: memref<1x1xf32, #tpu.memory_space<smem>>, %arg4: memref<8x128xf32, #tpu.memory_space<vmem>>, %arg5: memref<128x128xf32, #tpu.memory_space<vmem>>, %arg6: memref<128x128xf32, #tpu.memory_space<vmem>>, %arg7: memref<1x128xf32, #tpu.memory_space<vmem>>, %arg8: memref<8x128xf32, #tpu.memory_space<vmem>>, %arg9: memref<8x128xf32, #tpu.memory_space<vmem>>) attributes {dimension_semantics = [#tpu.dimension_semantics<parallel>, #tpu.dimension_semantics<parallel>, #tpu.dimension_semantics<arbitrary>], iteration_bounds = array<i64: 1, 1, 1>, scalar_prefetch = 0 : i64, scratch_operands = 1 : i64, tpu.core_type = #tpu.core_type<tc>, window_params = [{transform_indices = @transform_0, window_bounds = array<i64: 1, 1>}, {transform_indices = @transform_1, window_bounds = array<i64: 8, 128>}, {transform_indices = @transform_2, window_bounds = array<i64: 128, 128>}, {transform_indices = @transform_3, window_bounds = array<i64: 128, 128>}, {transform_indices = @transform_4, window_bounds = array<i64: 1, 128>}, {transform_indices = @transform_5, window_bounds = array<i64: 8, 128>}]} {
    %c0_i32 = arith.constant 0 : i32
    %0 = arith.cmpi eq, %arg2, %c0_i32 : i32
    %1 = arith.extui %0 : i1 to i32
    %c0_i32_0 = arith.constant 0 : i32
    %2 = arith.cmpi ne, %1, %c0_i32_0 : i32
    scf.if %2 {
      %cst_17 = arith.constant 0.000000e+00 : f32
      %26 = vector.broadcast %cst_17 : f32 to vector<8x128xf32>
      %c0_18 = arith.constant 0 : index
      %c0_19 = arith.constant 0 : index
      %27 = vector.load %arg9[%c0_18, %c0_19] : memref<8x128xf32, #tpu.memory_space<vmem>>, vector<8x128xf32>
      tpu.vector_store %arg9[%c0_18, %c0_19], %26 {strides = array<i32>} : memref<8x128xf32, #tpu.memory_space<vmem>>, vector<8x128xf32>,
    } else {
    }
    %c0 = arith.constant 0 : index
    %c0_1 = arith.constant 0 : index
    %3 = vector.load %arg5[%c0, %c0_1] : memref<128x128xf32, #tpu.memory_space<vmem>>, vector<128x128xf32>
    %c0_2 = arith.constant 0 : index
    %c0_3 = arith.constant 0 : index
    %4 = vector.load %arg6[%c0_2, %c0_3] : memref<128x128xf32, #tpu.memory_space<vmem>>, vector<128x128xf32>
    %c0_4 = arith.constant 0 : index
    %c0_5 = arith.constant 0 : index
    %5 = memref.load %arg3[%c0_4, %c0_5] : memref<1x1xf32, #tpu.memory_space<smem>>
    %cst = arith.constant 0.000000e+00 : f32
    %6 = vector.broadcast %cst : f32 to vector<128x128xf32>
    %7 = arith.cmpf ogt, %3, %6 : vector<128x128xf32>
    %8 = vector.broadcast %5 : f32 to vector<128x128xf32>
    %9 = arith.mulf %4, %8 : vector<128x128xf32>
    %10 = math.absf %3 : vector<128x128xf32>
    %11 = arith.cmpf olt, %9, %10 : vector<128x128xf32>
    %12 = arith.andi %7, %11 : vector<128x128xi1>
    %cst_6 = arith.constant 1.000000e+00 : f32
    %cst_7 = arith.constant 0.000000e+00 : f32
    %13 = vector.broadcast %cst_6 : f32 to vector<128x128xf32>
    %14 = vector.broadcast %cst_7 : f32 to vector<128x128xf32>
    %15 = arith.select %12, %13, %14 : vector<128x128xi1>, vector<128x128xf32>
    %16 = arith.truncf %15 : vector<128x128xf32> to vector<128x128xbf16>
    %c0_8 = arith.constant 0 : index
    %c0_9 = arith.constant 0 : index
    %17 = vector.load %arg4[%c0_8, %c0_9] : memref<8x128xf32, #tpu.memory_space<vmem>>, vector<8x128xf32>
    %18 = arith.truncf %17 : vector<8x128xf32> to vector<8x128xbf16>
    %c0_10 = arith.constant 0 : index
    %c0_11 = arith.constant 0 : index
    %19 = vector.load %arg9[%c0_10, %c0_11] : memref<8x128xf32, #tpu.memory_space<vmem>>, vector<8x128xf32>
    %cst_12 = arith.constant dense<0.000000e+00> : vector<8x128xf32>
    %20 = tpu.matmul %18, %16, %cst_12 {dimension_numbers = #tpu.dot_dimension_numbers<[1], [1], [0], [0], [0, 0, 1, 0], [], []>} : vector<8x128xbf16>, vector<128x128xbf16>, vector<8x128xf32> -> vector<8x128xf32>
    %21 = arith.addf %19, %20 : vector<8x128xf32>
    %c0_13 = arith.constant 0 : index
    %c0_14 = arith.constant 0 : index
    %22 = vector.load %arg9[%c0_13, %c0_14] : memref<8x128xf32, #tpu.memory_space<vmem>>, vector<8x128xf32>
    tpu.vector_store %arg9[%c0_13, %c0_14], %21 {strides = array<i32>} : memref<8x128xf32, #tpu.memory_space<vmem>>, vector<8x128xf32>,
    %c0_i32_15 = arith.constant 0 : i32
    %23 = arith.cmpi eq, %arg2, %c0_i32_15 : i32
    %24 = arith.extui %23 : i1 to i32
    %c0_i32_16 = arith.constant 0 : i32
    %25 = arith.cmpi ne, %24, %c0_i32_16 : i32
    scf.if %25 {
      %c0_17 = arith.constant 0 : index
      %c0_18 = arith.constant 0 : index
      %26 = vector.load %arg9[%c0_17, %c0_18] : memref<8x128xf32, #tpu.memory_space<vmem>>, vector<8x128xf32>
      %c0_19 = arith.constant 0 : index
      %c0_20 = arith.constant 0 : index
      %27 = vector.load %arg7[%c0_19, %c0_20] : memref<1x128xf32, #tpu.memory_space<vmem>>, vector<1x128xf32>
      %28 = vector.broadcast %27 : vector<1x128xf32> to vector<8x128xf32>
      %29 = arith.addf %26, %28 : vector<8x128xf32>
      %c0_21 = arith.constant 0 : index
      %c0_22 = arith.constant 0 : index
      %30 = vector.load %arg8[%c0_21, %c0_22] : memref<8x128xf32, #tpu.memory_space<vmem>>, vector<8x128xf32>
      tpu.vector_store %arg8[%c0_21, %c0_22], %29 {strides = array<i32>} : memref<8x128xf32, #tpu.memory_space<vmem>>, vector<8x128xf32>,
    } else {
    }
    return
  }
  func.func @transform_0(%arg0: i32, %arg1: i32, %arg2: i32) -> (i32, i32) {
    %c0_i32 = arith.constant 0 : i32
    %c0_i32_0 = arith.constant 0 : i32
    %c0_i32_1 = arith.constant 0 : i32
    return %c0_i32, %c0_i32_0 : i32, i32
  }
  func.func @transform_1(%arg0: i32, %arg1: i32, %arg2: i32) -> (i32, i32) {
    %c0_i32 = arith.constant 0 : i32
    return %arg0, %arg2 : i32, i32
  }
  func.func @transform_2(%arg0: i32, %arg1: i32, %arg2: i32) -> (i32, i32) {
    %c0_i32 = arith.constant 0 : i32
    return %arg1, %arg2 : i32, i32
  }
  func.func @transform_3(%arg0: i32, %arg1: i32, %arg2: i32) -> (i32, i32) {
    %c0_i32 = arith.constant 0 : i32
    return %arg1, %arg2 : i32, i32
  }
  func.func @transform_4(%arg0: i32, %arg1: i32, %arg2: i32) -> (i32, i32) {
    %c0_i32 = arith.constant 0 : i32
    %c0_i32_0 = arith.constant 0 : i32
    return %c0_i32, %arg1 : i32, i32
  }
  func.func @transform_5(%arg0: i32, %arg1: i32, %arg2: i32) -> (i32, i32) {
    %c0_i32 = arith.constant 0 : i32
    return %arg0, %arg1 : i32, i32
  }
}

</mosaic_0001>

<bundles_post_ra>
// kernel: tpu_custom_call.1
= control target key start
LH: loop header
LB: loop body
LE: loop exit
PB: predicated region body
PF: predicated region fallthrough
CT: control target
= control target key end

     0   :  { %11 = vsyncpa [#allocation5], 0  ;;  %s512_s0 = inlined_call_operand.<no memory space> [shape: f32[1,1], index: 0, kind: input, shape index: {}]   ;;  %s513_s1 = inlined_call_operand.hbm [shape: f32[8,128], index: 1, kind: input, shape index: {}]   ;;  %s514_s2 = inlined_call_operand.hbm [shape: f32[128,128], index: 2, kind: input, shape index: {}]   ;;  %s515_s3 = inlined_call_operand.hbm [shape: f32[128,128], index: 3, kind: input, shape index: {}]   ;;  %s516_s4 = inlined_call_operand.vmem [shape: f32[1,128], index: 4, kind: input, shape index: {}]   ;;  %s517_s5 = inlined_call_operand.hbm [shape: f32[8,128], index: 5, kind: output, shape index: {}]  }
   0x1   :  { %12 = vsyncpa [#allocation8], 0 }
   0x2   :  { %13 = vsyncpa [#allocation6], 0  ;;  %s420_s18 = smov [#allocation7]  }
   0x3   :  { %s31_s19 = sshll.u32 %s420_s18, 4  ;;  %s32_s19 = int_to_ptr.vmem [resolvable:$true] %s31_s19 }
   0x4   :  { %s342_s20 = scalar_lea.vmem %s32_s19, 2048  ;;  %p347_p1 = scmp.lt.s32.totalorder %s32_s19, %s32_s19 }
   0x5   :  { %p343_p0 = scmp.ne.s32.totalorder %s32_s19, %s342_s20  ;;  %p348_p2 = scmp.lt.s32.totalorder %s342_s20, %s342_s20 }
   0x7   :  { %p349_p3 = por %p348_p2, %p347_p1 }
   0x9   :  { %p350_p4 = pnand %p349_p3, %p343_p0 }
   0xb   :  { %353 = shalt.err (!%p350_p4)
}
   0xc   :  { %s421_s21 = smov 128   ;;  %s422_s22 = smov 8  }
   0xd   :  { %37 = dma.hbm_to_vmem [thread:$0]  %s514_s2, 2048, %s32_s19, [#allocation8], %s421_s21, %s421_s21, %s422_s22  }
   0xe   :  { %s423_s25 = smov [#allocation4]   ;;  %s424_s27 = smov [#allocation9]  }
   0xf   :  { %s22_s26 = sshll.u32 %s423_s25, 4  ;;  %s43_s28 = sshll.u32 %s424_s27, 4  ;;  %s23_s26 = int_to_ptr.vmem [resolvable:$true] %s22_s26  ;;  %s44_s28 = int_to_ptr.vmem [resolvable:$true] %s43_s28 }
  0x10   :  { %s362_s29 = scalar_lea.vmem %s23_s26, 128  ;;  %p367_p6 = scmp.lt.s32.totalorder %s23_s26, %s23_s26 }
  0x11   :  { %p363_p5 = scmp.ne.s32.totalorder %s23_s26, %s362_s29  ;;  %p368_p7 = scmp.lt.s32.totalorder %s362_s29, %s362_s29 }
  0x13   :  { %p369_p8 = por %p368_p7, %p367_p6 }
  0x15   :  { %p370_p9 = pnand %p369_p8, %p363_p5 }
  0x17   :  { %373 = shalt.err (!%p370_p9)
}
  0x18   :  { %25 = dma.hbm_to_vmem [thread:$0]  %s513_s1, 128, %s23_s26, [#allocation5]  }
  0x19   :  { %s382_s7 = scalar_lea.vmem %s44_s28, 2048  ;;  %p387_p11 = scmp.lt.s32.totalorder %s44_s28, %s44_s28 }
  0x1a   :  { %p383_p10 = scmp.ne.s32.totalorder %s44_s28, %s382_s7  ;;  %p388_p12 = scmp.lt.s32.totalorder %s382_s7, %s382_s7 }
  0x1c   :  { %p389_p13 = por %p388_p12, %p387_p11 }
  0x1e   :  { %p390_p0 = pnand %p389_p13, %p383_p10 }
  0x20   :  { %393 = shalt.err (!%p390_p0)
}
  0x21   :  { %49 = dma.hbm_to_vmem [thread:$0]  %s515_s3, 2048, %s44_s28, [#allocation8], %s421_s21, %s421_s21, %s422_s22  }
  0x22   :  { %414 = dma.done.wait [#allocation5], 128  }
  0x23   :  { %415 = vsyncadd [#allocation5], 4294967168 }
  0x24   :  { %416 = dma.done.wait [#allocation8], 4096  }
  0x25   :  { %417 = vsyncadd [#allocation8], 4294963200  ;;  %v425_v0 = vmov 0.0   ;;  %vm426_vm0 = vmmov 0   ;;  %v473_v1 = vstv %s512_s0  ;;  %v81_v2 = vld [vmem:[#allocation7 + $0x70] sm:$0xff]  ;;  %v82_v3 = vld [vmem:[#allocation7 + $0x78] sm:$0xff] }
  0x26   :  { %305 = vmatprep.subr.bf16.mxu0 %v425_v0  ;;  %321 = vmatprep.mubr.msk.bf16.mxu0 %vm426_vm0, %v425_v0  ;;  %v97_v4 = vld [vmem:[#allocation9 + $0x70] sm:$0xff]  ;;  %v98_v5 = vld [vmem:[#allocation9 + $0x78] sm:$0xff]  ;;  %vm114_vm1 = vcmp.gt.f32.partialorder %v81_v2, 0.0  ;;  %v147_v7 = vand.u32 2147483647, %v81_v2  ;;  %v79_v8 = vld [vmem:[#allocation7 + $0x60] sm:$0xff] }
  0x27   :  { %v131_v6 = vmul.f32 %v473_v1, %v97_v4  ;;  %vm115_vm2 = vcmp.gt.f32.partialorder %v82_v3, 0.0  ;;  %v132_v9 = vmul.f32 %v473_v1, %v98_v5  ;;  %v148_v10 = vand.u32 2147483647, %v82_v3  ;;  %v80_v11 = vld [vmem:[#allocation7 + $0x68] sm:$0xff]  ;;  %v95_v12 = vld [vmem:[#allocation9 + $0x60] sm:$0xff]  ;;  %v77_v18 = vld [vmem:[#allocation7 + $0x50] sm:$0xff] }
  0x28   :  { %v96_v13 = vld [vmem:[#allocation9 + $0x68] sm:$0xff]  ;;  %v129_v14 = vmul.f32 %v473_v1, %v95_v12  ;;  %v145_v16 = vand.u32 2147483647, %v79_v8  ;;  %v146_v17 = vand.u32 2147483647, %v80_v11  ;;  %vm112_vm7 = vcmp.gt.f32.partialorder %v79_v8, 0.0 }
  0x29   :  { %vm163_vm3 = vcmp.lt.f32.partialorder %v131_v6, %v147_v7  ;;  %v130_v15 = vmul.f32 %v473_v1, %v96_v13  ;;  %vm164_vm4 = vcmp.lt.f32.partialorder %v132_v9, %v148_v10  ;;  %vm113_vm9 = vcmp.gt.f32.partialorder %v80_v11, 0.0  ;;  %v93_v19 = vld [vmem:[#allocation9 + $0x50] sm:$0xff]  ;;  %v78_v21 = vld [vmem:[#allocation7 + $0x58] sm:$0xff]  ;;  %v75_v27 = vld [vmem:[#allocation7 + $0x40] sm:$0xff]  ;;  %s428_s10 = smov [#allocation10]  }
  0x2a   :  { %vm179_vm5 = vmand %vm114_vm1, %vm163_vm3  ;;  %vm161_vm10 = vcmp.lt.f32.partialorder %v129_v14, %v145_v16  ;;  %v427_v20 = vmov 1.0|1.0   ;;  %v94_v22 = vld [vmem:[#allocation9 + $0x58] sm:$0xff]  ;;  %v127_v23 = vmul.f32 %v473_v1, %v93_v19  ;;  %v143_v24 = vand.u32 2147483647, %v77_v18  ;;  %v91_v28 = vld [vmem:[#allocation9 + $0x40] sm:$0xff] }
  0x2b   :  { %vm180_vm6 = vmand %vm115_vm2, %vm164_vm4  ;;  %vm162_vm11 = vcmp.lt.f32.partialorder %v130_v15, %v146_v17  ;;  %v128_v25 = vmul.f32 %v473_v1, %v94_v22  ;;  %v144_v26 = vand.u32 2147483647, %v78_v21  ;;  %vm110_vm15 = vcmp.gt.f32.partialorder %v77_v18, 0.0  ;;  %v76_v29 = vld [vmem:[#allocation7 + $0x48] sm:$0xff]  ;;  %v73_v35 = vld [vmem:[#allocation7 + $0x30] sm:$0xff]  ;;  %s269_s11 = sshll.u32 %s428_s10, 4  ;;  %s270_s11 = int_to_ptr.vmem [resolvable:$true] %s269_s11 }
  0x2c   :  { %vm279_vm8 = vmpackc.low %vm180_vm6, %vm179_vm5  ;;  %vm159_vm0 = vcmp.lt.f32.partialorder %v127_v23, %v143_v24  ;;  %vm111_vm1 = vcmp.gt.f32.partialorder %v78_v21, 0.0  ;;  %v92_v30 = vld [vmem:[#allocation9 + $0x48] sm:$0xff]  ;;  %v125_v31 = vmul.f32 %v473_v1, %v91_v28  ;;  %v141_v32 = vand.u32 2147483647, %v75_v27  ;;  %v89_v36 = vld [vmem:[#allocation9 + $0x30] sm:$0xff]  ;;  %s394_s12 = scalar_lea.vmem %s270_s11, 128  ;;  %p399_p2 = scmp.lt.s32.totalorder %s270_s11, %s270_s11 }
  0x2d   :  { %306 = vmatpush3.bf16.xpose.msk.msra.mxu0 %vm279_vm8, %v427_v20  ;;  %vm177_vm12 = vmand %vm112_vm7, %vm161_vm10  ;;  %vm160_vm2 = vcmp.lt.f32.partialorder %v128_v25, %v144_v26  ;;  %v126_v33 = vmul.f32 %v473_v1, %v92_v30  ;;  %v142_v34 = vand.u32 2147483647, %v76_v29  ;;  %vm108_vm6 = vcmp.gt.f32.partialorder %v75_v27, 0.0  ;;  %v74_v37 = vld [vmem:[#allocation7 + $0x38] sm:$0xff]  ;;  %v71_v43 = vld [vmem:[#allocation7 + $0x20] sm:$0xff]  ;;  %p395_p1 = scmp.ne.s32.totalorder %s270_s11, %s394_s12  ;;  %p400_p3 = scmp.lt.s32.totalorder %s394_s12, %s394_s12 }
  0x2e   :  { %307 = vmatprep.subr.bf16.mxu0 %v425_v0  ;;  %vm178_vm13 = vmand %vm113_vm9, %vm162_vm11  ;;  %vm157_vm7 = vcmp.lt.f32.partialorder %v125_v31, %v141_v32  ;;  %vm109_vm8 = vcmp.gt.f32.partialorder %v76_v29, 0.0  ;;  %v90_v38 = vld [vmem:[#allocation9 + $0x38] sm:$0xff]  ;;  %v123_v39 = vmul.f32 %v473_v1, %v89_v36  ;;  %v139_v40 = vand.u32 2147483647, %v73_v35  ;;  %v87_v44 = vld [vmem:[#allocation9 + $0x20] sm:$0xff] }
  0x2f   :  { %vm281_vm14 = vmpackc.low %vm178_vm13, %vm177_vm12  ;;  %vm158_vm9 = vcmp.lt.f32.partialorder %v126_v33, %v142_v34  ;;  %v124_v41 = vmul.f32 %v473_v1, %v90_v38  ;;  %v140_v42 = vand.u32 2147483647, %v74_v37  ;;  %vm106_vm13 = vcmp.gt.f32.partialorder %v73_v35, 0.0  ;;  %v72_v45 = vld [vmem:[#allocation7 + $0x28] sm:$0xff]  ;;  %v69_v51 = vld [vmem:[#allocation7 + $0x10] sm:$0xff]  ;;  %p401_p4 = por %p400_p3, %p399_p2 }
  0x30   :  { %vm175_vm3 = vmand %vm110_vm15, %vm159_vm0  ;;  %vm107_vm15 = vcmp.gt.f32.partialorder %v74_v37, 0.0  ;;  %v88_v46 = vld [vmem:[#allocation9 + $0x28] sm:$0xff]  ;;  %v121_v47 = vmul.f32 %v473_v1, %v87_v44  ;;  %v137_v48 = vand.u32 2147483647, %v71_v43  ;;  %v138_v50 = vand.u32 2147483647, %v72_v45 }
  0x31   :  { %vm176_vm4 = vmand %vm111_vm1, %vm160_vm2  ;;  %vm156_vm0 = vcmp.lt.f32.partialorder %v124_v41, %v140_v42  ;;  %v122_v49 = vmul.f32 %v473_v1, %v88_v46  ;;  %v85_v52 = vld [vmem:[#allocation9 + $0x10] sm:$0xff]  ;;  %v70_v53 = vld [vmem:[#allocation7 + $0x18] sm:$0xff]  ;;  %v135_v56 = vand.u32 2147483647, %v69_v51  ;;  %p402_p5 = pnand %p401_p4, %p395_p1 }
  0x32   :  { %vm283_vm5 = vmpackc.low %vm176_vm4, %vm175_vm3  ;;  %vm104_vm4 = vcmp.gt.f32.partialorder %v71_v43, 0.0  ;;  %v86_v54 = vld [vmem:[#allocation9 + $0x18] sm:$0xff]  ;;  %v119_v55 = vmul.f32 %v473_v1, %v85_v52  ;;  %v136_v58 = vand.u32 2147483647, %v70_v53  ;;  %v67_v59 = vld [vmem:[#allocation7] sm:$0xff] }
  0x33   :  { %vm173_vm10 = vmand %vm108_vm6, %vm157_vm7  ;;  %vm105_vm6 = vcmp.gt.f32.partialorder %v72_v45, 0.0  ;;  %vm154_vm7 = vcmp.lt.f32.partialorder %v122_v49, %v138_v50  ;;  %v120_v57 = vmul.f32 %v473_v1, %v86_v54  ;;  %v83_v60 = vld [vmem:[#allocation9] sm:$0xff]  ;;  %v68_v61 = vld [vmem:[#allocation7 + $0x8] sm:$0xff]  ;;  %v133_v2 = vand.u32 2147483647, %v67_v59 }
  0x34   :  { %vm174_vm11 = vmand %vm109_vm8, %vm158_vm9  ;;  %v84_v62 = vld [vmem:[#allocation9 + $0x8] sm:$0xff]  ;;  %v117_v63 = vmul.f32 %v473_v1, %v83_v60  ;;  %v134_v4 = vand.u32 2147483647, %v68_v61  ;;  %v205_v5 = vld [vmem:[#allocation4] sm:$0xff] }
  0x35   :  { %308 = vmatpush3.bf16.xpose.msk.msra.mxu0 %vm281_vm14, %v427_v20  ;;  %vm285_vm12 = vmpackc.low %vm174_vm11, %vm173_vm10  ;;  %vm155_vm14 = vcmp.lt.f32.partialorder %v123_v39, %v139_v40  ;;  %vm102_vm11 = vcmp.gt.f32.partialorder %v69_v51, 0.0  ;;  %v118_v3 = vmul.f32 %v473_v1, %v84_v62  ;;  %v206_v6 = vpack.c.bf16 %v205_v5, %v205_v5  ;;  %v295_v1 = vld [vmem:[%s516_s4] ss:$0 sm:$0xff] }
  0x36   :  { %309 = vmatprep.subr.bf16.mxu0 %v425_v0  ;;  %vm171_vm1 = vmand %vm106_vm13, %vm155_vm14  ;;  %vm103_vm13 = vcmp.gt.f32.partialorder %v70_v53, 0.0  ;;  %vm152_vm14 = vcmp.lt.f32.partialorder %v120_v57, %v136_v58 }
  0x37   :  { %vm172_vm2 = vmand %vm107_vm15, %vm156_vm0 }
  0x38   :  { %vm287_vm3 = vmpackc.low %vm172_vm2, %vm171_vm1  ;;  %vm100_vm2 = vcmp.gt.f32.partialorder %v67_v59, 0.0 }
  0x39   :  { %vm170_vm9 = vmand %vm105_vm6, %vm154_vm7 }
  0x3a   :  { %vm168_vm0 = vmand %vm103_vm13, %vm152_vm14 }
  0x3d   :  { %310 = vmatpush3.bf16.xpose.msk.msra.mxu0 %vm283_vm5, %v427_v20  ;;  %vm153_vm5 = vcmp.lt.f32.partialorder %v121_v47, %v137_v48 }
  0x3e   :  { %311 = vmatprep.subr.bf16.mxu0 %v425_v0  ;;  %vm169_vm8 = vmand %vm104_vm4, %vm153_vm5  ;;  %vm101_vm4 = vcmp.gt.f32.partialorder %v68_v61, 0.0  ;;  %vm150_vm5 = vcmp.lt.f32.partialorder %v118_v3, %v134_v4 }
  0x3f   :  { %vm289_vm10 = vmpackc.low %vm170_vm9, %vm169_vm8 }
  0x40   :  { %vm166_vm7 = vmand %vm101_vm4, %vm150_vm5 }
  0x45   :  { %312 = vmatpush3.bf16.xpose.msk.msra.mxu0 %vm285_vm12, %v427_v20  ;;  %vm151_vm12 = vcmp.lt.f32.partialorder %v119_v55, %v135_v56 }
  0x46   :  { %313 = vmatprep.subr.bf16.mxu0 %v425_v0  ;;  %vm167_vm15 = vmand %vm102_vm11, %vm151_vm12 }
  0x47   :  { %vm291_vm1 = vmpackc.low %vm168_vm0, %vm167_vm15 }
  0x4d   :  { %314 = vmatpush3.bf16.xpose.msk.msra.mxu0 %vm287_vm3, %v427_v20  ;;  %vm149_vm3 = vcmp.lt.f32.partialorder %v117_v63, %v133_v2 }
  0x4e   :  { %315 = vmatprep.subr.bf16.mxu0 %v425_v0  ;;  %vm165_vm6 = vmand %vm100_vm2, %vm149_vm3 }
  0x4f   :  { %vm293_vm8 = vmpackc.low %vm166_vm7, %vm165_vm6 }
  0x55   :  { %316 = vmatpush3.bf16.xpose.msk.msra.mxu0 %vm289_vm10, %v427_v20 }
  0x56   :  { %317 = vmatprep.subr.bf16.mxu0 %v425_v0 }
  0x5d   :  { %318 = vmatpush3.bf16.xpose.msk.msra.mxu0 %vm291_vm1, %v427_v20 }
  0x5e   :  { %319 = vmatprep.subr.bf16.mxu0 %v425_v0 }
  0x65   :  { %320 = vmatpush3.bf16.xpose.msk.msra.mxu0 %vm293_vm8, %v427_v20 }
  0x6c   :  { %322 = vmatmul.mubr.bf16.vlgmr.msra.gmra.mxu0 %v206_v6 }
 0x12c   :  { %v242_v7 = vpop.f32.mrf.mxu0 }
 0x12d   :  { %v261_v8 = vadd.f32 %v295_v1, %v242_v7 }
 0x12e   :  { %v323_v9 = vpop.f32.mrf.mxu0 }
 0x12f   :  { %262 = vst [vmem:[#allocation10] sm:$0xff] %v261_v8 }
 0x130   :  { %v245_v0 = vpop.f32.mrf.mxu0 }
 0x131   :  { %405 = shalt.err (!%p402_p5)
}
 0x132   :  { %272 = dma.vmem_to_hbm [thread:$0]  %s270_s11, 128, %s517_s5, [#allocation6]   ;;  %v324_v10 = vpop.f32.mrf.mxu0 }
 0x133   :  { %418 = dma.done.wait [#allocation6], 128  }
 0x134   :  { %419 = vsyncadd [#allocation6], 4294967168 }
 0x135   :  { %276 = vsyncpa [#allocation5], 1 }
 0x136   :  { %277 = vsyncpa [#allocation8], 1 }
 0x137   :  { %278 = vsyncpa [#allocation6], 1 }

</bundles_post_ra>
